<compile_context>
chip_gen: v5e
topology: v5e:2x2
jax: 0.10.0
libtpu: 0.0.40
codegen_flags: <defaults>
</compile_context>

<pallas_src>
import jax
import jax.numpy as jnp
from jax.experimental import pallas as pl
from jax.experimental.pallas import tpu as pltpu


def _round_up(x, m):
    return (x + m - 1) // m * m


def _cdiv(a, b):
    return -(-a // b)


def gate_kernel(x_ref, w1_ref, b1_ref, w2_ref, b2_ref, o_ref, z_acc):
    """Grid = (row blocks, W1-output-column blocks)."""
    j = pl.program_id(1)

    @pl.when(j == 0)
    def _init():
        z_acc[...] = jnp.zeros_like(z_acc)

    # Layer 1 (this column block of W1) on the MXU with f32 accumulation.
    # x is cast in-kernel to W1's dtype (no-op for f32, bf16 for the fast
    # path) -- avoids a wrapper-side HBM cast pass over x.
    x = x_ref[...].astype(w1_ref.dtype)
    h = jnp.dot(x, w1_ref[...], preferred_element_type=jnp.float32)
    h = jnp.maximum(h + b1_ref[...], 0.0)                 # bias + ReLU, f32 VPU

    # Layer 2 partial sum: VPU multiply by the (1, te) w2 row + lane reduce.
    # keepdims keeps the batch dim on sublanes, so the result is already in
    # the (tm, 1) output layout -- no sublane->lane relayout.
    z_acc[...] += jnp.sum(h * w2_ref[...], axis=-1, keepdims=True)

    @pl.when(j == pl.num_programs(1) - 1)
    def _finalize():
        o_ref[...] = jax.nn.sigmoid(z_acc[...] + b2_ref[0, 0]).astype(o_ref.dtype)


def _vmem_budget_bytes():
    """~75% of physical VMEM: ~48 MiB on v7x, ~96 MiB on v5e/v6e."""
    try:
        phys = pltpu.get_tpu_info().vmem_capacity_bytes
    except Exception:
        phys = 64 * 1024 * 1024          # conservative fallback (v7x physical)
    return min(max(int(phys * 3 // 4), 32 << 20), 96 << 20)


def _plan_tiles(m_rows, emb_dim, x_itemsize, w1_itemsize, row_tile, col_tile, budget):
    """Pick (tm, te) from the padded, double-buffered VMEM footprint."""
    e_sub = _round_up(emb_dim, 8)        # W1 sublane padding
    e_lane = _round_up(emb_dim, 128)     # lane padding of x / W1 rows

    # ---- W1 column tile (te): resident W1 (double-buffered worst case) must
    # stay under ~half the budget; otherwise stream it column-tiled.
    if col_tile is not None:
        te = col_tile
    else:
        te = emb_dim
        if 2 * e_sub * e_lane * w1_itemsize > budget // 2:
            for cand in (2048, 1024, 512, 256, 128):
                if emb_dim % cand == 0 and 2 * e_sub * cand * w1_itemsize <= budget // 2:
                    te = cand
                    break
            # TODO(synk): if emb_dim has no suitable multiple-of-128 divisor we
            # fall back to te=emb_dim (mitigate with bf16 W1 / higher vmem cap).
    if emb_dim % te != 0:
        te = emb_dim                     # never allow ragged W1 column blocks
    te_lane = _round_up(te, 128)

    w1_bytes = 2 * e_sub * te_lane * w1_itemsize      # double-buffered W1 block
    vec_bytes = 2 * 2 * 8 * te_lane * 4               # b1 + w2, sublane-padded

    # ---- row tile (tm): fill the remaining budget with the x stream.
    # Per row: x (double-buffered, lane-padded) + (tm,1) out x2 + z_acc scratch.
    per_row = 2 * e_lane * x_itemsize + 3 * 512
    remaining = max(budget - w1_bytes - vec_bytes, 1 << 20)
    tm_cap = max(8, min(8192, (remaining // per_row) // 8 * 8))

    if row_tile is not None:
        tm = row_tile
    else:
        n_steps = max(1, _cdiv(m_rows, tm_cap))        # balance steps, avoid a
        tm = _round_up(_cdiv(m_rows, n_steps), 8)      # nearly-empty last tile
    return tm, te


def gate_forward(x, w1, b1, w2, b2, num_groups, *,
                 matmul_dtype=None, row_tile=None, col_tile=None):
    """Pallas forward of the PyTorch Gate module.

    x:  (N, emb_dim) activations.
    w1: (emb_dim, emb_dim) first Linear weight stored (in, out).
        NOTE: PyTorch nn.Linear stores (out, in) -- pass `linear.weight.T`.
    b1: (1, emb_dim) first Linear bias.
    w2: (1, emb_dim) second Linear weight row (nn.Linear(E, 1).weight).
    b2: (1, 1) second Linear bias.
    matmul_dtype: optional lower precision (e.g. jnp.bfloat16) for the layer-1
        MXU inputs; only W1 is cast here, x is cast inside the kernel, and
        accumulation / elementwise math stays f32.

    Returns (weight[:g], weight[g:2g]), each of shape (g, 1).
    """
    n_rows, emb_dim = x.shape
    g = num_groups
    m_rows = min(2 * g, n_rows)

    # Only the first 2*num_groups rows are ever consumed by the module.
    x = x[:m_rows]

    if matmul_dtype is not None:
        w1 = w1.astype(matmul_dtype)     # halves resident VMEM for large E
    b1 = b1.astype(jnp.float32)
    w2 = w2.astype(jnp.float32)
    b2 = b2.astype(jnp.float32)

    budget = _vmem_budget_bytes()
    tm, te = _plan_tiles(m_rows, emb_dim, x.dtype.itemsize, w1.dtype.itemsize,
                         row_tile, col_tile, budget)

    grid_n = _cdiv(m_rows, tm)
    grid_e = _cdiv(emb_dim, te)
    m_pad = grid_n * tm
    if m_pad != m_rows:                  # zero-padded last row tile
        x = jnp.pad(x, ((0, m_pad - m_rows), (0, 0)))

    out = pl.pallas_call(
        gate_kernel,
        out_shape=jax.ShapeDtypeStruct((m_pad, 1), jnp.float32),
        grid=(grid_n, grid_e),
        in_specs=[
            pl.BlockSpec((tm, emb_dim), lambda i, j: (i, 0)),   # x: streams over rows
            pl.BlockSpec((emb_dim, te), lambda i, j: (0, j)),   # W1 resident / col-streamed
            pl.BlockSpec((1, te), lambda i, j: (0, j)),         # b1
            pl.BlockSpec((1, te), lambda i, j: (0, j)),         # w2 row
            pl.BlockSpec(memory_space=pltpu.MemorySpace.SMEM),  # b2 scalar
        ],
        out_specs=pl.BlockSpec((tm, 1), lambda i, j: (i, 0)),   # (tm,1): no relayout
        scratch_shapes=[pltpu.VMEM((tm, 1), jnp.float32)],      # z accumulator
        compiler_params=pltpu.CompilerParams(
            dimension_semantics=("parallel", "arbitrary"),      # v7x: rows split across TCs
            vmem_limit_bytes=budget,
        ),
    )(x, w1, b1, w2, b2)

    weight = out[:m_rows]
    return weight[0:g], weight[g:2 * g]


def init_gate_params(key, emb_dim):
    """PyTorch nn.Linear-style U(-1/sqrt(fan_in), +) init; W1 stored (in, out)."""
    k1, k2, k3, k4 = jax.random.split(key, 4)
    bound = 1.0 / jnp.sqrt(emb_dim)
    w1 = jax.random.uniform(k1, (emb_dim, emb_dim), jnp.float32, -bound, bound)
    b1 = jax.random.uniform(k2, (1, emb_dim), jnp.float32, -bound, bound)
    w2 = jax.random.uniform(k3, (1, emb_dim), jnp.float32, -bound, bound)
    b2 = jax.random.uniform(k4, (1, 1), jnp.float32, -bound, bound)
    return w1, b1, w2, b2


def _reference(x, w1, b1, w2, b2):
    h = jnp.maximum(x @ w1 + b1, 0.0)
    return jax.nn.sigmoid(h @ w2.T + b2)   # (N, 1)


if __name__ == "__main__":
    key = jax.random.PRNGKey(0)
    k1, k2, k3, k4 = jax.random.split(key, 4)

    # --- Case 1: spec-sized Gate (single block, single grid step). ---
    emb_dim, num_groups = 32, 4
    n = 2 * num_groups
    x = jax.random.normal(k1, (n, emb_dim), dtype=jnp.float32)
    w1, b1, w2, b2 = init_gate_params(k2, emb_dim)

    out_a, out_b = gate_forward(x, w1, b1, w2, b2, num_groups)
    jax.block_until_ready((out_a, out_b))
    ref = _reference(x, w1, b1, w2, b2)
    assert out_a.shape == (num_groups, 1) and out_b.shape == (num_groups, 1)
    assert jnp.allclose(out_a, ref[:num_groups], atol=1e-5)
    assert jnp.allclose(out_b, ref[num_groups:2 * num_groups], atol=1e-5)

    # --- Case 2: multi-step row grid + zero-padded last tile; extra x rows
    # beyond 2*num_groups are skipped entirely. ---
    g2 = 100                                           # 2g = 200 rows used of 512
    x2 = jax.random.normal(k3, (512, emb_dim), dtype=jnp.float32)
    a2, c2 = gate_forward(x2, w1, b1, w2, b2, g2, row_tile=64)
    jax.block_until_ready((a2, c2))
    ref2 = _reference(x2[:2 * g2], w1, b1, w2, b2)
    assert jnp.allclose(a2, ref2[:g2], atol=1e-5)
    assert jnp.allclose(c2, ref2[g2:2 * g2], atol=1e-5)

    # --- Case 3: column-tiled W1 (large-E accumulator path). ---
    emb3, g3 = 256, 8
    x3 = jax.random.normal(k4, (64, emb3), dtype=jnp.float32)
    w1_3, b1_3, w2_3, b2_3 = init_gate_params(k2, emb3)
    a3, c3 = gate_forward(x3, w1_3, b1_3, w2_3, b2_3, g3, col_tile=128)
    jax.block_until_ready((a3, c3))
    ref3 = _reference(x3[:2 * g3], w1_3, b1_3, w2_3, b2_3)
    assert jnp.allclose(a3, ref3[:g3], atol=1e-5)
    assert jnp.allclose(c3, ref3[g3:2 * g3], atol=1e-5)

    # --- Case 4: bf16 MXU inputs (x cast in-kernel, W1 cast at wrapper). ---
    a4, c4 = gate_forward(x3, w1_3, b1_3, w2_3, b2_3, g3, matmul_dtype=jnp.bfloat16)
    jax.block_until_ready((a4, c4))
    assert jnp.allclose(a4, ref3[:g3], atol=3e-2)
    assert jnp.allclose(c4, ref3[g3:2 * g3], atol=3e-2)

    print("KERNEL_OK")
</pallas_src>

<mosaic_0001>
module attributes {stable_mosaic.version = 11 : i64} {
  func.func @gate_kernel(%arg0: i32, %arg1: i32, %arg2: memref<8x32xf32, #tpu.memory_space<vmem>>, %arg3: memref<32x32xf32, #tpu.memory_space<vmem>>, %arg4: memref<1x32xf32, #tpu.memory_space<vmem>>, %arg5: memref<1x32xf32, #tpu.memory_space<vmem>>, %arg6: memref<1x1xf32, #tpu.memory_space<smem>>, %arg7: memref<8x1xf32, #tpu.memory_space<vmem>>, %arg8: memref<8x1xf32, #tpu.memory_space<vmem>>) attributes {dimension_semantics = [#tpu.dimension_semantics<parallel>, #tpu.dimension_semantics<arbitrary>], iteration_bounds = array<i64: 1, 1>, scalar_prefetch = 0 : i64, scratch_operands = 1 : i64, tpu.core_type = #tpu.core_type<tc>, window_params = [{transform_indices = @transform_0, window_bounds = array<i64: 8, 32>}, {transform_indices = @transform_1, window_bounds = array<i64: 32, 32>}, {transform_indices = @transform_2, window_bounds = array<i64: 1, 32>}, {transform_indices = @transform_3, window_bounds = array<i64: 1, 32>}, {transform_indices = @transform_4, window_bounds = array<i64: 1, 1>}, {transform_indices = @transform_5, window_bounds = array<i64: 8, 1>}]} {
    %c0_i32 = arith.constant 0 : i32
    %0 = arith.cmpi eq, %arg1, %c0_i32 : i32
    %1 = arith.extui %0 : i1 to i32
    %c0_i32_0 = arith.constant 0 : i32
    %2 = arith.cmpi ne, %1, %c0_i32_0 : i32
    scf.if %2 {
      %cst_16 = arith.constant 0.000000e+00 : f32
      %22 = vector.broadcast %cst_16 : f32 to vector<8x1xf32>
      %c0_17 = arith.constant 0 : index
      %c0_18 = arith.constant 0 : index
      %23 = vector.load %arg8[%c0_17, %c0_18] : memref<8x1xf32, #tpu.memory_space<vmem>>, vector<8x1xf32>
      tpu.vector_store %arg8[%c0_17, %c0_18], %22 {strides = array<i32>} : memref<8x1xf32, #tpu.memory_space<vmem>>, vector<8x1xf32>,
    } else {
    }
    %c0 = arith.constant 0 : index
    %c0_1 = arith.constant 0 : index
    %3 = vector.load %arg2[%c0, %c0_1] : memref<8x32xf32, #tpu.memory_space<vmem>>, vector<8x32xf32>
    %c0_2 = arith.constant 0 : index
    %c0_3 = arith.constant 0 : index
    %4 = vector.load %arg3[%c0_2, %c0_3] : memref<32x32xf32, #tpu.memory_space<vmem>>, vector<32x32xf32>
    %cst = arith.constant dense<0.000000e+00> : vector<8x32xf32>
    %5 = tpu.matmul %3, %4, %cst {dimension_numbers = #tpu.dot_dimension_numbers<[1], [0], [0], [1], [0, 0, 1, 1], [], []>} : vector<8x32xf32>, vector<32x32xf32>, vector<8x32xf32> -> vector<8x32xf32>
    %c0_4 = arith.constant 0 : index
    %c0_5 = arith.constant 0 : index
    %6 = vector.load %arg4[%c0_4, %c0_5] : memref<1x32xf32, #tpu.memory_space<vmem>>, vector<1x32xf32>
    %7 = vector.broadcast %6 : vector<1x32xf32> to vector<8x32xf32>
    %8 = arith.addf %5, %7 : vector<8x32xf32>
    %cst_6 = arith.constant 0.000000e+00 : f32
    %9 = vector.broadcast %cst_6 : f32 to vector<8x32xf32>
    %10 = arith.maximumf %8, %9 : vector<8x32xf32>
    %c0_7 = arith.constant 0 : index
    %c0_8 = arith.constant 0 : index
    %11 = vector.load %arg8[%c0_7, %c0_8] : memref<8x1xf32, #tpu.memory_space<vmem>>, vector<8x1xf32>
    %c0_9 = arith.constant 0 : index
    %c0_10 = arith.constant 0 : index
    %12 = vector.load %arg5[%c0_9, %c0_10] : memref<1x32xf32, #tpu.memory_space<vmem>>, vector<1x32xf32>
    %13 = vector.broadcast %12 : vector<1x32xf32> to vector<8x32xf32>
    %14 = arith.mulf %10, %13 : vector<8x32xf32>
    %cst_11 = arith.constant dense<0.000000e+00> : vector<8xf32>
    %15 = vector.multi_reduction <add>, %14, %cst_11 [1] : vector<8x32xf32> to vector<8xf32>
    %16 = vector.shape_cast %15 : vector<8xf32> to vector<8x1xf32>
    %17 = arith.addf %11, %16 : vector<8x1xf32>
    %c0_12 = arith.constant 0 : index
    %c0_13 = arith.constant 0 : index
    %18 = vector.load %arg8[%c0_12, %c0_13] : memref<8x1xf32, #tpu.memory_space<vmem>>, vector<8x1xf32>
    tpu.vector_store %arg8[%c0_12, %c0_13], %17 {strides = array<i32>} : memref<8x1xf32, #tpu.memory_space<vmem>>, vector<8x1xf32>,
    %c0_i32_14 = arith.constant 0 : i32
    %19 = arith.cmpi eq, %arg1, %c0_i32_14 : i32
    %20 = arith.extui %19 : i1 to i32
    %c0_i32_15 = arith.constant 0 : i32
    %21 = arith.cmpi ne, %20, %c0_i32_15 : i32
    scf.if %21 {
      %c0_16 = arith.constant 0 : index
      %c0_17 = arith.constant 0 : index
      %22 = vector.load %arg8[%c0_16, %c0_17] : memref<8x1xf32, #tpu.memory_space<vmem>>, vector<8x1xf32>
      %c0_18 = arith.constant 0 : index
      %c0_19 = arith.constant 0 : index
      %23 = memref.load %arg6[%c0_18, %c0_19] : memref<1x1xf32, #tpu.memory_space<smem>>
      %24 = vector.broadcast %23 : f32 to vector<8x1xf32>
      %25 = arith.addf %22, %24 : vector<8x1xf32>
      %26 = arith.negf %25 : vector<8x1xf32>
      %27 = math.exp %26 : vector<8x1xf32>
      %cst_20 = arith.constant 1.000000e+00 : f32
      %28 = vector.broadcast %cst_20 : f32 to vector<8x1xf32>
      %29 = arith.addf %28, %27 : vector<8x1xf32>
      %30 = arith.divf %28, %29 : vector<8x1xf32>
      %c0_21 = arith.constant 0 : index
      %c0_22 = arith.constant 0 : index
      %31 = vector.load %arg7[%c0_21, %c0_22] : memref<8x1xf32, #tpu.memory_space<vmem>>, vector<8x1xf32>
      tpu.vector_store %arg7[%c0_21, %c0_22], %30 {strides = array<i32>} : memref<8x1xf32, #tpu.memory_space<vmem>>, vector<8x1xf32>,
    } else {
    }
    return
  }
  func.func @transform_0(%arg0: i32, %arg1: i32) -> (i32, i32) {
    %c0_i32 = arith.constant 0 : i32
    %c0_i32_0 = arith.constant 0 : i32
    return %arg0, %c0_i32 : i32, i32
  }
  func.func @transform_1(%arg0: i32, %arg1: i32) -> (i32, i32) {
    %c0_i32 = arith.constant 0 : i32
    %c0_i32_0 = arith.constant 0 : i32
    return %c0_i32, %arg1 : i32, i32
  }
  func.func @transform_2(%arg0: i32, %arg1: i32) -> (i32, i32) {
    %c0_i32 = arith.constant 0 : i32
    %c0_i32_0 = arith.constant 0 : i32
    return %c0_i32, %arg1 : i32, i32
  }
  func.func @transform_3(%arg0: i32, %arg1: i32) -> (i32, i32) {
    %c0_i32 = arith.constant 0 : i32
    %c0_i32_0 = arith.constant 0 : i32
    return %c0_i32, %arg1 : i32, i32
  }
  func.func @transform_4(%arg0: i32, %arg1: i32) -> (i32, i32) {
    %c0_i32 = arith.constant 0 : i32
    %c0_i32_0 = arith.constant 0 : i32
    %c0_i32_1 = arith.constant 0 : i32
    return %c0_i32, %c0_i32_0 : i32, i32
  }
  func.func @transform_5(%arg0: i32, %arg1: i32) -> (i32, i32) {
    %c0_i32 = arith.constant 0 : i32
    %c0_i32_0 = arith.constant 0 : i32
    return %arg0, %c0_i32 : i32, i32
  }
}

</mosaic_0001>

<bundles_post_ra>
// kernel: tpu_custom_call.1
= control target key start
LH: loop header
LB: loop body
LE: loop exit
PB: predicated region body
PF: predicated region fallthrough
CT: control target
= control target key end

     0   :  { %11 = vsyncpa [#allocation5], 0  ;;  %s257_s0 = inlined_call_operand.hbm [shape: f32[8,32], index: 0, kind: input, shape index: {}]   ;;  %s258_s1 = inlined_call_operand.hbm [shape: f32[32,32], index: 1, kind: input, shape index: {}]   ;;  %s259_s2 = inlined_call_operand.vmem [shape: f32[1,32], index: 2, kind: input, shape index: {}]   ;;  %s260_s3 = inlined_call_operand.vmem [shape: f32[1,32], index: 3, kind: input, shape index: {}]   ;;  %s261_s4 = inlined_call_operand.<no memory space> [shape: f32[1,1], index: 4, kind: input, shape index: {}]   ;;  %s262_s5 = inlined_call_operand.vmem [shape: f32[8,1], index: 5, kind: output, shape index: {}]  }
   0x1   :  { %s18_s20 = sshll.u32 %s257_s0, 4  ;;  %s19_s20 = int_to_ptr.hbm [resolvable:$true] %s18_s20 }
   0x2   :  { %12 = vsyncpa [#allocation7], 0  ;;  %s201_s21 = smov [#allocation4]   ;;  %s28_s25 = sshll.u32 %s258_s1, 4  ;;  %s29_s25 = int_to_ptr.hbm [resolvable:$true] %s28_s25 }
   0x3   :  { %s20_s22 = sshll.u32 %s201_s21, 4  ;;  %s202_s26 = smov [#allocation6]   ;;  %s21_s22 = int_to_ptr.vmem [resolvable:$true] %s20_s22 }
   0x4   :  { %23 = dma.hbm_to_vmem [thread:$0]  %s19_s20, 128, %s21_s22, [#allocation5]  }
   0x5   :  { %s30_s27 = sshll.u32 %s202_s26, 4  ;;  %s203_s28 = smov 128   ;;  %s31_s27 = int_to_ptr.vmem [resolvable:$true] %s30_s27 }
   0x6   :  { %s204_s29 = smov 8  }
   0x7   :  { %36 = dma.hbm_to_vmem [thread:$0]  %s29_s25, 512, %s31_s27, [#allocation7], %s203_s28, %s203_s28, %s204_s29  }
   0x8   :  { %197 = dma.done.wait [#allocation5], 128  }
   0x9   :  { %198 = vsyncadd [#allocation5], 4294967168 }
   0xa   :  { %199 = dma.done.wait [#allocation7], 512  }
   0xb   :  { %200 = vsyncadd [#allocation7], 4294966784  ;;  %v61_v0 = vld [vmem:[#allocation6 + $0x18] sm:$0xff]  ;;  %v60_v1 = vld [vmem:[#allocation6 + $0x10] sm:$0xff]  ;;  %vm66_vm0 = vcmask 261120   ;;  %vm55_vm1 = vcmask 7168   ;;  %v108_v16 = vstv %s261_s4 }
   0xc   :  { %82 = vmatpush.msra.mxu0 %v61_v0  ;;  %v59_v2 = vld [vmem:[#allocation6 + $0x8] sm:$0xff]  ;;  %v58_v3 = vld [vmem:[#allocation6] sm:$0xff]  ;;  %v57_v4 = vld [vmem:[#allocation4] sm:$0xff]  ;;  %v205_v5 = vmov 0.0  }
   0xd   :  { %56 = vst.msk [vmem:[#allocation2] sm:$0xff] %vm55_vm1, %v205_v5  ;;  %v143_v6 = vld [vmem:[%s259_s2] ss:$0 sm:$0xff] }
   0xe   :  { %83 = vmatpush.msra.mxu0 %v60_v1  ;;  %v144_v9 = vld [vmem:[%s260_s3] ss:$0 sm:$0xff] }
  0x10   :  { %84 = vmatpush.msra.mxu0 %v59_v2 }
  0x12   :  { %85 = vmatpush.msra.mxu0 %v58_v3 }
  0x13   :  { %136 = vmatmul.msk.f32.vlgmr.msra.gmra.mxu0 %vm66_vm0, %v57_v4 }
  0x14   :  { %v91_v13 = vld [vmem:[#allocation2] sm:$0xff] }
  0x90   :  { %v87_v7 = vpop.f32.mrf.mxu0 }
  0x91   :  { %v88_v8 = vadd.f32 %v143_v6, %v87_v7 }
  0x93   :  { %v90_v10 = vmax.f32 %v88_v8, 0.0 }
  0x95   :  { %v96_v11 = vmul.f32 %v144_v9, %v90_v10 }
  0x97   :  { %v97_v12 = vsel %vm66_vm0, %v96_v11, 0.0 }
  0x98   :  { %98 = vadd.xlane.f32.xlu0 %v97_v12 }
 0x10b   :  { %v99_v14 = vpop.xlane.xlu0 %98 }
 0x10c   :  { %v100_v15 = vadd.f32 %v99_v14, %v91_v13 }
 0x10e   :  { %102 = vst.msk [vmem:[#allocation2] sm:$0xff] %vm55_vm1, %v100_v15 }
 0x115   :  { %v106_v17 = vld [vmem:[#allocation2] sm:$0xff] }
 0x116   :  { %v109_v18 = vadd.f32 %v108_v16, %v106_v17 }
 0x118   :  { %v137_v19 = vmul.f32 -1.442695, %v109_v18 }
 0x11a   :  { %145 = vpow2.f32 %v137_v19 }
 0x120   :  { %v146_v20 = vpop.eup %145 }
 0x121   :  { %v113_v21 = vadd.f32 1.0, %v146_v20 }
 0x123   :  { %147 = vrcp.f32 %v113_v21  ;;  %v125_v25 = vand.u32 2147483648, %v113_v21  ;;  %v123_v27 = vand.u32 2147483647, %v113_v21  ;;  %vm119_vm3 = vweird.f32 %v113_v21 }
 0x125   :  { %v126_v29 = vor.u32 1.1754944e-38, %v125_v25  ;;  %vm124_vm5 = vcmp.eq.f32.partialorder %v123_v27, 8.507059e+37 }
 0x129   :  { %v148_v22 = vpop.eup %147 }
 0x12a   :  { %v115_v23 = vmul.f32 %v148_v22, %v113_v21  ;;  %vm120_vm2 = vweird.f32 %v148_v22 }
 0x12b   :  { %vm121_vm4 = vmor %vm119_vm3, %vm120_vm2 }
 0x12c   :  { %v116_v24 = vsub.f32 1.0, %v115_v23 }
 0x12e   :  { %v117_v26 = vmul.f32 %v148_v22, %v116_v24 }
 0x130   :  { %v118_v28 = vadd.f32 %v148_v22, %v117_v26 }
 0x132   :  { %v122_v30 = vsel %vm121_vm4, %v148_v22, %v118_v28 }
 0x133   :  { %v127_v31 = vsel %vm124_vm5, %v126_v29, %v122_v30 }
 0x134   :  { %129 = vst.msk [vmem:[%s262_s5] sm:$0xff] %vm55_vm1, %v127_v31 }
 0x135   :  { %134 = vsyncpa [#allocation5], 1 }
 0x136   :  { %135 = vsyncpa [#allocation7], 1 }

</bundles_post_ra>
